<compile_context>
chip_gen: v7x
topology: tpu7x:2x2x1
jax: 0.10.0
libtpu: 0.0.40
codegen_flags: <defaults>
</compile_context>

<pallas_src>
import jax
import jax.numpy as jnp
from jax.experimental import pallas as pl
from jax.experimental.pallas import tpu as pltpu


# ----------------------------- model config (small analog) -------------------
BATCH = 8
SEQ = 8
HIDDEN = 32            # encoder hidden_size analog
FEATURES_DIM = 33      # includes the element that gets .pop()'ed into `embeddings`
EMB_DIM = 64           # analog of the hard-coded 768
FFLAYERS = 2
TARGET_COLS = ["t0", "t1", "t2"]
ACTIVATION = "relu"    # 'relu' or 'leaky-relu'
OUT_PAD = 128          # lane-dense output slab; wrapper slices back to len(TARGET_COLS)

# TODO(synk): at real 768-dim scale: pad rows toward the MXU row count (128/256),
#             tile cls1/hidden matmuls over K ('arbitrary', last grid axis) with an
#             f32 VMEM scratch accumulator + pl.when init/finalize, keep weights as
#             constant-index resident blocks, budget vmem_limit_bytes for v7x's
#             64 MiB VMEM, and quantize weights int8 on v5e/v6e vs fp8 on v7x.


# ----------------------------- fused Pallas kernel ---------------------------

def _make_fused_kernel(n_hidden, bias_widths, activation):
    """Fully fused head: pooling + concat + cls1 + ff hidden layers + output."""

    def _act(y):
        if activation == "relu":
            return jnp.maximum(y, 0.0)
        if activation == "leaky-relu":               # nn.LeakyReLU default slope
            return jnp.where(y > 0.0, y, 0.01 * y)
        return y

    def kernel(h_ref, m_ref, f_ref, e_ref, w1_ref, *rest):
        hidden_w_refs = rest[:n_hidden]
        wo_ref, bias_ref, o_ref = rest[n_hidden:]

        # ---- masked mean pooling: pure VPU multiply + reduce (no MXU pushes) ----
        h = h_ref[...]                                        # (TB, S, H) f32
        m = m_ref[...]                                        # (TB, S)    f32
        sum_emb = jnp.sum(h * m[:, :, None], axis=1)          # (TB, H)
        sum_msk = jnp.maximum(jnp.sum(m, axis=1, keepdims=True), 1e-9)  # torch clamp
        logits = sum_emb / sum_msk                            # exact divide

        # ---- virtual concat [logits | features | embeddings] -> ONE K-wide dot ----
        combined = jnp.concatenate(
            [logits, f_ref[...], e_ref[...]], axis=1)         # (TB, H+F+E) f32
        acc = jnp.dot(combined.astype(jnp.bfloat16), w1_ref[...],
                      preferred_element_type=jnp.float32)
        out = _act(acc + bias_ref[0:1, :bias_widths[0]])

        # ---- feed-forward hidden layers (all in VMEM/vregs) ----
        for li in range(n_hidden):
            y = jnp.dot(out.astype(jnp.bfloat16), hidden_w_refs[li][...],
                        preferred_element_type=jnp.float32)
            out = _act(y + bias_ref[li + 1:li + 2, :bias_widths[li + 1]])

        # ---- output layer (padded to OUT_PAD lanes -> single unmasked store) ----
        y = jnp.dot(out.astype(jnp.bfloat16), wo_ref[...],
                    preferred_element_type=jnp.float32)
        o_ref[...] = y + bias_ref[n_hidden + 1:n_hidden + 2, :bias_widths[n_hidden + 1]]

    return kernel


# ----------------------------- parameters ------------------------------------

def _init_linear(key, din, dout):
    """PyTorch-style init: U(-1/sqrt(din), 1/sqrt(din))."""
    kw, kb = jax.random.split(key)
    bound = 1.0 / jnp.sqrt(jnp.float32(din))
    w = jax.random.uniform(kw, (din, dout), jnp.float32, -bound, bound)
    b = jax.random.uniform(kb, (1, dout), jnp.float32, -bound, bound)
    return w, b


def init_params(key):
    """Initialize AND pre-pack weights into kernel-ready form (one-time cost)."""
    size = HIDDEN + FEATURES_DIM + (EMB_DIM - 1)   # cls_layer1 input dim == concat width
    n_out = len(TARGET_COLS)

    key, k = jax.random.split(key)
    w1, b1 = _init_linear(k, size, 2 * size)
    s = 2 * size
    hidden = []
    for _ in range(FFLAYERS):
        o = s // 2
        key, k = jax.random.split(key)
        hidden.append(_init_linear(k, s, o))
        s = o
    key, k = jax.random.split(key)
    wo, bo = _init_linear(k, s, n_out)

    # ---- hoisted, one-time kernel-ready preparation ----
    w1_bf = w1.astype(jnp.bfloat16)
    wh_bf = tuple(w.astype(jnp.bfloat16) for w, _ in hidden)
    wo_pad = jnp.zeros((wo.shape[0], OUT_PAD), jnp.bfloat16).at[:, :n_out].set(
        wo.astype(jnp.bfloat16))

    # pack every bias into one padded f32 slab -> single DMA descriptor
    bo_pad = jnp.zeros((1, OUT_PAD), jnp.float32).at[:, :n_out].set(bo)
    all_biases = [b1] + [b for _, b in hidden] + [bo_pad]
    max_w = max(b.shape[1] for b in all_biases)
    slab = jnp.zeros((len(all_biases), max_w), jnp.float32)
    for i, b in enumerate(all_biases):
        slab = slab.at[i, :b.shape[1]].set(b[0])

    return {"w1": w1_bf, "wh": wh_bf, "wo": wo_pad, "bias_slab": slab}


# ----------------------------- forward ----------------------------------------

def regressor_forward(params, last_hidden_state, attention_mask, features, embeddings):
    B, S, H = last_hidden_state.shape
    F = features.shape[1]
    E = embeddings.shape[1]
    n_out = len(TARGET_COLS)

    hidden_ws = params["wh"]
    n_hidden = len(hidden_ws)
    bias_widths = (params["w1"].shape[1],) + tuple(w.shape[1] for w in hidden_ws) + (OUT_PAD,)

    TB = B          # one row-tile per grid step; at larger B this shards across v7x TCs
    grid = (B // TB,)

    def const_spec(shape):
        nd = len(shape)
        return pl.BlockSpec(shape, lambda i, _nd=nd: (0,) * _nd)   # resident weights

    in_specs = [
        pl.BlockSpec((TB, S, H), lambda i: (i, 0, 0)),   # last_hidden_state
        pl.BlockSpec((TB, S), lambda i: (i, 0)),         # attention mask
        pl.BlockSpec((TB, F), lambda i: (i, 0)),         # features
        pl.BlockSpec((TB, E), lambda i: (i, 0)),         # embeddings
        const_spec(params["w1"].shape),
        *[const_spec(w.shape) for w in hidden_ws],
        const_spec(params["wo"].shape),
        const_spec(params["bias_slab"].shape),
    ]
    out_specs = pl.BlockSpec((TB, OUT_PAD), lambda i: (i, 0))

    kernel = _make_fused_kernel(n_hidden, bias_widths, ACTIVATION)

    out_padded = pl.pallas_call(
        kernel,
        out_shape=jax.ShapeDtypeStruct((B, OUT_PAD), jnp.float32),
        grid=grid,
        in_specs=in_specs,
        out_specs=out_specs,
        compiler_params=pltpu.CompilerParams(
            dimension_semantics=("parallel",),
            vmem_limit_bytes=32 * 1024 * 1024,
        ),
    )(last_hidden_state, attention_mask, features, embeddings,
      params["w1"], *hidden_ws, params["wo"], params["bias_slab"])

    # dropout (self.drop) is identity at inference
    return out_padded[:, :n_out]


regressor_forward = jax.jit(regressor_forward)


# ----------------------------- pure-JAX reference ------------------------------

def _reference_forward(params, last_hidden_state, attention_mask, features, embeddings):
    m = attention_mask[:, :, None]
    sum_emb = jnp.sum(last_hidden_state * m, axis=1)
    sum_msk = jnp.maximum(jnp.sum(m, axis=1), 1e-9)
    logits = sum_emb / sum_msk
    x = jnp.concatenate([logits, features, embeddings], axis=1)
    widths = [params["w1"].shape[1]] + [w.shape[1] for w in params["wh"]] + [OUT_PAD]
    biases = [params["bias_slab"][i, :w] for i, w in enumerate(widths)]
    act = (lambda y: jnp.maximum(y, 0.0)) if ACTIVATION == "relu" \
        else (lambda y: jnp.where(y > 0.0, y, 0.01 * y))
    out = act(x @ params["w1"].astype(jnp.float32) + biases[0])
    for i, w in enumerate(params["wh"]):
        out = act(out @ w.astype(jnp.float32) + biases[i + 1])
    out = out @ params["wo"].astype(jnp.float32) + biases[-1]
    return out[:, :len(TARGET_COLS)]


# ----------------------------- main --------------------------------------------

if __name__ == "__main__":
    root = jax.random.PRNGKey(0)
    k_param, k_h, k_f, k_e = jax.random.split(root, 4)

    params = init_params(k_param)

    # synthetic encoder output (stands in for AutoModel.last_hidden_state)
    last_hidden_state = jax.random.normal(k_h, (BATCH, SEQ, HIDDEN), jnp.float32)
    # attention mask: first 6 tokens valid, last 2 padded
    attention_mask = jnp.concatenate(
        [jnp.ones((BATCH, SEQ - 2), jnp.float32), jnp.zeros((BATCH, 2), jnp.float32)],
        axis=1,
    )
    # tabular features (after the embedding element has been popped off)
    features = jax.random.normal(k_f, (BATCH, FEATURES_DIM - 1), jnp.float32)
    # the popped per-row embedding (768-analog)
    embeddings = jax.random.normal(k_e, (BATCH, EMB_DIM), jnp.float32)

    out = regressor_forward(params, last_hidden_state, attention_mask, features, embeddings)
    out = jax.block_until_ready(out)

    assert out.shape == (BATCH, len(TARGET_COLS)), out.shape
    assert bool(jnp.all(jnp.isfinite(out)))

    ref = _reference_forward(params, last_hidden_state, attention_mask, features, embeddings)
    assert float(jnp.max(jnp.abs(out - ref))) < 5e-2, "kernel/reference mismatch"

    print("KERNEL_OK")
</pallas_src>

<mosaic_0001>
module attributes {stable_mosaic.version = 11 : i64} {
  func.func @kernel(%arg0: i32, %arg1: memref<8x8x32xf32, #tpu.memory_space<vmem>>, %arg2: memref<8x8xf32, #tpu.memory_space<vmem>>, %arg3: memref<8x32xf32, #tpu.memory_space<vmem>>, %arg4: memref<8x64xf32, #tpu.memory_space<vmem>>, %arg5: memref<128x256xbf16, #tpu.memory_space<vmem>>, %arg6: memref<256x128xbf16, #tpu.memory_space<vmem>>, %arg7: memref<128x64xbf16, #tpu.memory_space<vmem>>, %arg8: memref<64x128xbf16, #tpu.memory_space<vmem>>, %arg9: memref<4x256xf32, #tpu.memory_space<vmem>>, %arg10: memref<8x128xf32, #tpu.memory_space<vmem>>) attributes {dimension_semantics = [#tpu.dimension_semantics<parallel>], iteration_bounds = array<i64: 1>, scalar_prefetch = 0 : i64, scratch_operands = 0 : i64, tpu.core_type = #tpu.core_type<tc>, window_params = [{transform_indices = @transform_0, window_bounds = array<i64: 8, 8, 32>}, {transform_indices = @transform_1, window_bounds = array<i64: 8, 8>}, {transform_indices = @transform_2, window_bounds = array<i64: 8, 32>}, {transform_indices = @transform_3, window_bounds = array<i64: 8, 64>}, {pipeline_mode = #tpu.pipeline_mode<synchronous>, transform_indices = @transform_4, window_bounds = array<i64: 128, 256>}, {pipeline_mode = #tpu.pipeline_mode<synchronous>, transform_indices = @transform_5, window_bounds = array<i64: 256, 128>}, {pipeline_mode = #tpu.pipeline_mode<synchronous>, transform_indices = @transform_6, window_bounds = array<i64: 128, 64>}, {pipeline_mode = #tpu.pipeline_mode<synchronous>, transform_indices = @transform_7, window_bounds = array<i64: 64, 128>}, {pipeline_mode = #tpu.pipeline_mode<synchronous>, transform_indices = @transform_8, window_bounds = array<i64: 4, 256>}, {transform_indices = @transform_9, window_bounds = array<i64: 8, 128>}]} {
    %c0 = arith.constant 0 : index
    %c0_0 = arith.constant 0 : index
    %c0_1 = arith.constant 0 : index
    %0 = vector.load %arg1[%c0, %c0_0, %c0_1] : memref<8x8x32xf32, #tpu.memory_space<vmem>>, vector<8x8x32xf32>
    %c0_2 = arith.constant 0 : index
    %c0_3 = arith.constant 0 : index
    %1 = vector.load %arg2[%c0_2, %c0_3] : memref<8x8xf32, #tpu.memory_space<vmem>>, vector<8x8xf32>
    %2 = vector.shape_cast %1 : vector<8x8xf32> to vector<8x8x1xf32>
    %3 = vector.broadcast %2 : vector<8x8x1xf32> to vector<8x8x32xf32>
    %4 = arith.mulf %0, %3 : vector<8x8x32xf32>
    %cst = arith.constant dense<0.000000e+00> : vector<8x32xf32>
    %5 = vector.multi_reduction <add>, %4, %cst [1] : vector<8x8x32xf32> to vector<8x32xf32>
    %cst_4 = arith.constant dense<0.000000e+00> : vector<8xf32>
    %6 = vector.multi_reduction <add>, %1, %cst_4 [1] : vector<8x8xf32> to vector<8xf32>
    %7 = vector.shape_cast %6 : vector<8xf32> to vector<8x1xf32>
    %cst_5 = arith.constant 9.99999971E-10 : f32
    %8 = vector.broadcast %cst_5 : f32 to vector<8x1xf32>
    %9 = arith.maximumf %7, %8 : vector<8x1xf32>
    %10 = vector.broadcast %9 : vector<8x1xf32> to vector<8x32xf32>
    %11 = arith.divf %5, %10 : vector<8x32xf32>
    %c0_6 = arith.constant 0 : index
    %c0_7 = arith.constant 0 : index
    %12 = vector.load %arg3[%c0_6, %c0_7] : memref<8x32xf32, #tpu.memory_space<vmem>>, vector<8x32xf32>
    %c0_8 = arith.constant 0 : index
    %c0_9 = arith.constant 0 : index
    %13 = vector.load %arg4[%c0_8, %c0_9] : memref<8x64xf32, #tpu.memory_space<vmem>>, vector<8x64xf32>
    %14 = tpu.concatenate %11, %12, %13 in 1 : vector<8x32xf32>, vector<8x32xf32>, vector<8x64xf32> -> vector<8x128xf32>
    %15 = arith.truncf %14 : vector<8x128xf32> to vector<8x128xbf16>
    %c0_10 = arith.constant 0 : index
    %c0_11 = arith.constant 0 : index
    %16 = vector.load %arg5[%c0_10, %c0_11] : memref<128x256xbf16, #tpu.memory_space<vmem>>, vector<128x256xbf16>
    %cst_12 = arith.constant dense<0.000000e+00> : vector<8x256xf32>
    %17 = tpu.matmul %15, %16, %cst_12 {dimension_numbers = #tpu.dot_dimension_numbers<[1], [0], [0], [1], [0, 0, 1, 1], [], []>} : vector<8x128xbf16>, vector<128x256xbf16>, vector<8x256xf32> -> vector<8x256xf32>
    %c0_13 = arith.constant 0 : index
    %c0_14 = arith.constant 0 : index
    %18 = vector.load %arg9[%c0_13, %c0_14] : memref<4x256xf32, #tpu.memory_space<vmem>>, vector<1x256xf32>
    %19 = vector.broadcast %18 : vector<1x256xf32> to vector<8x256xf32>
    %20 = arith.addf %17, %19 : vector<8x256xf32>
    %cst_15 = arith.constant 0.000000e+00 : f32
    %21 = vector.broadcast %cst_15 : f32 to vector<8x256xf32>
    %22 = arith.maximumf %20, %21 : vector<8x256xf32>
    %23 = arith.truncf %22 : vector<8x256xf32> to vector<8x256xbf16>
    %c0_16 = arith.constant 0 : index
    %c0_17 = arith.constant 0 : index
    %24 = vector.load %arg6[%c0_16, %c0_17] : memref<256x128xbf16, #tpu.memory_space<vmem>>, vector<256x128xbf16>
    %cst_18 = arith.constant dense<0.000000e+00> : vector<8x128xf32>
    %25 = tpu.matmul %23, %24, %cst_18 {dimension_numbers = #tpu.dot_dimension_numbers<[1], [0], [0], [1], [0, 0, 1, 1], [], []>} : vector<8x256xbf16>, vector<256x128xbf16>, vector<8x128xf32> -> vector<8x128xf32>
    %c1 = arith.constant 1 : index
    %c0_19 = arith.constant 0 : index
    %26 = vector.load %arg9[%c1, %c0_19] : memref<4x256xf32, #tpu.memory_space<vmem>>, vector<1x128xf32>
    %27 = vector.broadcast %26 : vector<1x128xf32> to vector<8x128xf32>
    %28 = arith.addf %25, %27 : vector<8x128xf32>
    %cst_20 = arith.constant 0.000000e+00 : f32
    %29 = vector.broadcast %cst_20 : f32 to vector<8x128xf32>
    %30 = arith.maximumf %28, %29 : vector<8x128xf32>
    %31 = arith.truncf %30 : vector<8x128xf32> to vector<8x128xbf16>
    %c0_21 = arith.constant 0 : index
    %c0_22 = arith.constant 0 : index
    %32 = vector.load %arg7[%c0_21, %c0_22] : memref<128x64xbf16, #tpu.memory_space<vmem>>, vector<128x64xbf16>
    %cst_23 = arith.constant dense<0.000000e+00> : vector<8x64xf32>
    %33 = tpu.matmul %31, %32, %cst_23 {dimension_numbers = #tpu.dot_dimension_numbers<[1], [0], [0], [1], [0, 0, 1, 1], [], []>} : vector<8x128xbf16>, vector<128x64xbf16>, vector<8x64xf32> -> vector<8x64xf32>
    %c2 = arith.constant 2 : index
    %c0_24 = arith.constant 0 : index
    %34 = vector.load %arg9[%c2, %c0_24] : memref<4x256xf32, #tpu.memory_space<vmem>>, vector<1x64xf32>
    %35 = vector.broadcast %34 : vector<1x64xf32> to vector<8x64xf32>
    %36 = arith.addf %33, %35 : vector<8x64xf32>
    %cst_25 = arith.constant 0.000000e+00 : f32
    %37 = vector.broadcast %cst_25 : f32 to vector<8x64xf32>
    %38 = arith.maximumf %36, %37 : vector<8x64xf32>
    %39 = arith.truncf %38 : vector<8x64xf32> to vector<8x64xbf16>
    %c0_26 = arith.constant 0 : index
    %c0_27 = arith.constant 0 : index
    %40 = vector.load %arg8[%c0_26, %c0_27] : memref<64x128xbf16, #tpu.memory_space<vmem>>, vector<64x128xbf16>
    %cst_28 = arith.constant dense<0.000000e+00> : vector<8x128xf32>
    %41 = tpu.matmul %39, %40, %cst_28 {dimension_numbers = #tpu.dot_dimension_numbers<[1], [0], [0], [1], [0, 0, 1, 1], [], []>} : vector<8x64xbf16>, vector<64x128xbf16>, vector<8x128xf32> -> vector<8x128xf32>
    %c3 = arith.constant 3 : index
    %c0_29 = arith.constant 0 : index
    %42 = vector.load %arg9[%c3, %c0_29] : memref<4x256xf32, #tpu.memory_space<vmem>>, vector<1x128xf32>
    %43 = vector.broadcast %42 : vector<1x128xf32> to vector<8x128xf32>
    %44 = arith.addf %41, %43 : vector<8x128xf32>
    %c0_30 = arith.constant 0 : index
    %c0_31 = arith.constant 0 : index
    %45 = vector.load %arg10[%c0_30, %c0_31] : memref<8x128xf32, #tpu.memory_space<vmem>>, vector<8x128xf32>
    tpu.vector_store %arg10[%c0_30, %c0_31], %44 {strides = array<i32>} : memref<8x128xf32, #tpu.memory_space<vmem>>, vector<8x128xf32>,
    return
  }
  func.func @transform_0(%arg0: i32) -> (i32, i32, i32) {
    %c0_i32 = arith.constant 0 : i32
    %c0_i32_0 = arith.constant 0 : i32
    %c0_i32_1 = arith.constant 0 : i32
    return %arg0, %c0_i32, %c0_i32_0 : i32, i32, i32
  }
  func.func @transform_1(%arg0: i32) -> (i32, i32) {
    %c0_i32 = arith.constant 0 : i32
    %c0_i32_0 = arith.constant 0 : i32
    return %arg0, %c0_i32 : i32, i32
  }
  func.func @transform_2(%arg0: i32) -> (i32, i32) {
    %c0_i32 = arith.constant 0 : i32
    %c0_i32_0 = arith.constant 0 : i32
    return %arg0, %c0_i32 : i32, i32
  }
  func.func @transform_3(%arg0: i32) -> (i32, i32) {
    %c0_i32 = arith.constant 0 : i32
    %c0_i32_0 = arith.constant 0 : i32
    return %arg0, %c0_i32 : i32, i32
  }
  func.func @transform_4(%arg0: i32) -> (i32, i32) {
    %c0_i32 = arith.constant 0 : i32
    %c0_i32_0 = arith.constant 0 : i32
    %c0_i32_1 = arith.constant 0 : i32
    return %c0_i32, %c0_i32_0 : i32, i32
  }
  func.func @transform_5(%arg0: i32) -> (i32, i32) {
    %c0_i32 = arith.constant 0 : i32
    %c0_i32_0 = arith.constant 0 : i32
    %c0_i32_1 = arith.constant 0 : i32
    return %c0_i32, %c0_i32_0 : i32, i32
  }
  func.func @transform_6(%arg0: i32) -> (i32, i32) {
    %c0_i32 = arith.constant 0 : i32
    %c0_i32_0 = arith.constant 0 : i32
    %c0_i32_1 = arith.constant 0 : i32
    return %c0_i32, %c0_i32_0 : i32, i32
  }
  func.func @transform_7(%arg0: i32) -> (i32, i32) {
    %c0_i32 = arith.constant 0 : i32
    %c0_i32_0 = arith.constant 0 : i32
    %c0_i32_1 = arith.constant 0 : i32
    return %c0_i32, %c0_i32_0 : i32, i32
  }
  func.func @transform_8(%arg0: i32) -> (i32, i32) {
    %c0_i32 = arith.constant 0 : i32
    %c0_i32_0 = arith.constant 0 : i32
    %c0_i32_1 = arith.constant 0 : i32
    return %c0_i32, %c0_i32_0 : i32, i32
  }
  func.func @transform_9(%arg0: i32) -> (i32, i32) {
    %c0_i32 = arith.constant 0 : i32
    %c0_i32_0 = arith.constant 0 : i32
    return %arg0, %c0_i32 : i32, i32
  }
}

</mosaic_0001>

<bundles_post_ra>
// kernel: regressor_forward.1
= control target key start
LH: loop header
LB: loop body
LE: loop exit
PB: predicated region body
PF: predicated region fallthrough
CT: control target
= control target key end

     0   :  { %14 = vsyncpa [#allocation3], 0  ;;  %s1275_s0 = inlined_call_operand.vmem [shape: f32[8,8,32], index: 0, kind: input, shape index: {}]   ;;  %s1276_s1 = inlined_call_operand.vmem [shape: f32[8,8], index: 1, kind: input, shape index: {}]   ;;  %s1277_s2 = inlined_call_operand.vmem [shape: f32[8,32], index: 2, kind: input, shape index: {}]   ;;  %s1278_s3 = inlined_call_operand.vmem [shape: f32[8,64], index: 3, kind: input, shape index: {}]   ;;  %s1279_s4 = inlined_call_operand.hbm [shape: bf16[128,256], index: 4, kind: input, shape index: {}]   ;;  %s1280_s5 = inlined_call_operand.hbm [shape: bf16[256,128], index: 5, kind: input, shape index: {}]   ;;  %s1281_s6 = inlined_call_operand.vmem [shape: bf16[128,64], index: 6, kind: input, shape index: {}]   ;;  %s1282_s7 = inlined_call_operand.vmem [shape: bf16[64,128], index: 7, kind: input, shape index: {}]   ;;  %s1283_s8 = inlined_call_operand.hbm [shape: f32[4,256], index: 8, kind: input, shape index: {}]   ;;  %s1284_s9 = inlined_call_operand.vmem [shape: f32[8,128], index: 9, kind: output, shape index: {}]  }
   0x1   :  { %15 = vsyncpa [#allocation5], 0  ;;  %s1074_s30 = smov [#allocation4]   ;;  %s1004_s13 = scalar_lea.hbm %s1280_s5, 2048 }
   0x2   :  { %s41_s10 = sshll.u32 %s1074_s30, 4  ;;  %p1005_p0 = scmp.ne.s32.totalorder %s1280_s5, %s1004_s13  ;;  %s42_s10 = int_to_ptr.vmem [resolvable:$true] %s41_s10 }
   0x3   :  { %p1008_p1 = scmp.lt.u32.totalorder %s1004_s13, %s1280_s5 }
   0x5   :  { %p1010_p2 = pnand %p1008_p1, %p1005_p0 }
   0x7   :  { %1013 = shalt.err (!%p1010_p2)
}
   0x8   :  { %s1014_s18 = scalar_lea.vmem %s42_s10, 2048  ;;  %p1019_p4 = scmp.lt.s32.totalorder %s42_s10, %s42_s10 }
   0x9   :  { %p1015_p3 = scmp.ne.s32.totalorder %s42_s10, %s1014_s18  ;;  %p1020_p5 = scmp.lt.s32.totalorder %s1014_s18, %s1014_s18 }
   0xb   :  { %p1021_p6 = por %p1020_p5, %p1019_p4 }
   0xd   :  { %p1022_p7 = pnand %p1021_p6, %p1015_p3 }
   0xf   :  { %1025 = shalt.err (!%p1022_p7)
}
  0x10   :  { %s1075_s19 = smov 64   ;;  %s1076_s20 = smov 4  }
  0x11   :  { %47 = dma.hbm_to_vmem [thread:$0]  %s1280_s5, 2048, %s42_s10, [#allocation5], %s1075_s19, %s1075_s19, %s1076_s20  }
  0x12   :  { %s1077_s23 = smov [#allocation2]   ;;  %s1026_s27 = scalar_lea.hbm %s1279_s4, 2048 }
  0x13   :  { %s29_s24 = sshll.u32 %s1077_s23, 4  ;;  %p1027_p8 = scmp.ne.s32.totalorder %s1279_s4, %s1026_s27  ;;  %s30_s24 = int_to_ptr.vmem [resolvable:$true] %s29_s24 }
  0x14   :  { %p1030_p9 = scmp.lt.u32.totalorder %s1026_s27, %s1279_s4 }
  0x16   :  { %p1032_p10 = pnand %p1030_p9, %p1027_p8 }
  0x18   :  { %1035 = shalt.err (!%p1032_p10)
}
  0x19   :  { %s1036_s12 = scalar_lea.vmem %s30_s24, 2048  ;;  %p1041_p12 = scmp.lt.s32.totalorder %s30_s24, %s30_s24 }
  0x1a   :  { %p1037_p11 = scmp.ne.s32.totalorder %s30_s24, %s1036_s12  ;;  %p1042_p13 = scmp.lt.s32.totalorder %s1036_s12, %s1036_s12 }
  0x1c   :  { %p1043_p0 = por %p1042_p13, %p1041_p12 }
  0x1e   :  { %p1044_p1 = pnand %p1043_p0, %p1037_p11 }
  0x20   :  { %1047 = shalt.err (!%p1044_p1)
}
  0x21   :  { %s1078_s5 = smov 128   ;;  %s1079_s10 = smov 8  }
  0x22   :  { %35 = dma.hbm_to_vmem [thread:$0]  %s1279_s4, 2048, %s30_s24, [#allocation3], %s1078_s5, %s1078_s5, %s1079_s10  }
  0x23   :  { %s1080_s15 = smov [#allocation6]   ;;  %s1048_s20 = scalar_lea.hbm %s1283_s8, 128 }
  0x24   :  { %s58_s16 = sshll.u32 %s1080_s15, 4  ;;  %p1049_p2 = scmp.ne.s32.totalorder %s1283_s8, %s1048_s20  ;;  %s59_s16 = int_to_ptr.vmem [resolvable:$true] %s58_s16 }
  0x25   :  { %p1052_p3 = scmp.lt.u32.totalorder %s1048_s20, %s1283_s8 }
  0x27   :  { %p1054_p4 = pnand %p1052_p3, %p1049_p2 }
  0x29   :  { %1057 = shalt.err (!%p1054_p4)
}
  0x2a   :  { %s1058_s26 = scalar_lea.vmem %s59_s16, 128  ;;  %p1063_p6 = scmp.lt.s32.totalorder %s59_s16, %s59_s16 }
  0x2b   :  { %p1059_p5 = scmp.ne.s32.totalorder %s59_s16, %s1058_s26  ;;  %p1064_p7 = scmp.lt.s32.totalorder %s1058_s26, %s1058_s26 }
  0x2d   :  { %p1065_p8 = por %p1064_p7, %p1063_p6 }
  0x2f   :  { %p1066_p9 = pnand %p1065_p8, %p1059_p5 }
  0x31   :  { %1069 = shalt.err (!%p1066_p9)
}
  0x32   :  { %61 = dma.hbm_to_vmem [thread:$0]  %s1283_s8, 128, %s59_s16, [#allocation5]  }
  0x33   :  { %1070 = dma.done.wait [#allocation3], 2048  }
  0x34   :  { %1071 = vsyncadd [#allocation3], 4294965248 }
  0x35   :  { %1072 = dma.done.wait [#allocation5], 2176  }
  0x36   :  { %1073 = vsyncadd [#allocation5], 4294965120  ;;  %v81_v0 = vlaneseq  ;;  %vm202_vm0 = vcmask 64512   ;;  %v80_v4 = vld [vmem:[%s1276_s1] sm:$0xff]  ;;  %v939_v21 = vld [vmem:[#allocation2 + $0x14] ss:$8 sps:$4 sm:$0xff]  }
  0x37   :  { %v203_v5 = vsel %vm202_vm0, %v80_v4, 0.0  ;;  %v936_v16 = vld [vmem:[#allocation2 + $0x4] ss:$8 sps:$4 sm:$0xff]   ;;  %v938_v17 = vld [vmem:[#allocation2] ss:$8 sps:$4 sm:$0xff]   ;;  %s1081_s11 = smov 32  }
  0x38   :  { %v1173_v1 = vshrl.u32 %v81_v0, 7  ;;  %204 = vadd.xlane.f32.xlu0 %v203_v5  ;;  %391 = vmatprep.subr.bf16.mxu0 %v936_v16  ;;  %v941_v22 = vld [vmem:[#allocation2 + $0x10] ss:$8 sps:$4 sm:$0xff]   ;;  %v239_v24 = vld [vmem:[%s1277_s2] sm:$0xff]  ;;  %v945_v28 = vld [vmem:[#allocation2 + $0x34] ss:$8 sps:$4 sm:$0xff]  }
  0x39   :  { %392 = vmatpush1.bf16.msra.mxu0 %v938_v17  ;;  %v942_v25 = vld [vmem:[#allocation2 + $0x24] ss:$8 sps:$4 sm:$0xff]   ;;  %v944_v26 = vld [vmem:[#allocation2 + $0x20] ss:$8 sps:$4 sm:$0xff]   ;;  %v947_v29 = vld [vmem:[#allocation2 + $0x30] ss:$8 sps:$4 sm:$0xff]  }
  0x3a   :  { %v97_v2 = vsub.s32 2, %v1173_v1  ;;  %v83_v3 = vsub.s32 0, %v1173_v1  ;;  %v104_v8 = vsub.s32 3, %v1173_v1  ;;  %v111_v10 = vsub.s32 4, %v1173_v1  ;;  %393 = vmatprep.subr.bf16.mxu0 %v939_v21  ;;  %v240_v27 = vld [vmem:[%s1278_s3] sm:$0xff]  ;;  %v962_v41 = vld [vmem:[#allocation4 + $0x48] sm:$0xff]  }
  0x3b   :  { %v118_v12 = vsub.s32 5, %v1173_v1  ;;  %v125_v14 = vsub.s32 6, %v1173_v1  ;;  %v90_v15 = vsub.s32 1, %v1173_v1  ;;  %v132_v19 = vsub.s32 7, %v1173_v1  ;;  %v948_v30 = vld [vmem:[#allocation2 + $0x44] ss:$8 sps:$4 sm:$0xff]  }
  0x3c   :  { %v98_v6 = vrot.slane %v80_v4, %v97_v2  ;;  %v84_v7 = vrot.slane %v80_v4, %v83_v3  ;;  %v105_v9 = vrot.slane %v80_v4, %v104_v8  ;;  %v112_v11 = vrot.slane %v80_v4, %v111_v10  ;;  %v950_v31 = vld [vmem:[#allocation2 + $0x40] ss:$8 sps:$4 sm:$0xff]   ;;  %v951_v32 = vld [vmem:[#allocation2 + $0x54] ss:$8 sps:$4 sm:$0xff]   ;;  %v953_v33 = vld [vmem:[#allocation2 + $0x50] ss:$8 sps:$4 sm:$0xff]  }
  0x3d   :  { %v119_v13 = vrot.slane %v80_v4, %v118_v12  ;;  %v126_v18 = vrot.slane %v80_v4, %v125_v14  ;;  %v91_v20 = vrot.slane %v80_v4, %v90_v15  ;;  %v133_v23 = vrot.slane %v80_v4, %v132_v19  ;;  %394 = vmatpush1.bf16.msra.mxu0 %v941_v22  ;;  %v954_v34 = vld [vmem:[#allocation2 + $0x64] ss:$8 sps:$4 sm:$0xff]   ;;  %v956_v35 = vld [vmem:[#allocation2 + $0x60] ss:$8 sps:$4 sm:$0xff]   ;;  %v957_v36 = vld [vmem:[#allocation2 + $0x74] ss:$8 sps:$4 sm:$0xff]  }
  0x3e   :  { %100 = vbcast.lane.b32.xlu1 %v98_v6, 256  ;;  %395 = vmatprep.subr.bf16.mxu0 %v942_v25  ;;  %v959_v37 = vld [vmem:[#allocation2 + $0x70] ss:$8 sps:$4 sm:$0xff]   ;;  %v1082_v38 = vmov 0   ;;  %v960_v39 = vld [vmem:[#allocation4 + $0x40] sm:$0xff]   ;;  %v963_v42 = vld [vmem:[#allocation4 + $0x8] sm:$0xff]  }
  0x3f   :  { %423 = vmatprep.mubr.bf16.mxu0 %v1082_v38  ;;  %v961_v40 = vld [vmem:[#allocation4] sm:$0xff]   ;;  %857 = vmatprep.subr.bf16.mxu1 %v960_v39  ;;  %v964_v43 = vld [vmem:[#allocation4 + $0x50] sm:$0xff]   ;;  %v966_v45 = vld [vmem:[#allocation4 + $0x58] sm:$0xff]   ;;  %vm145_vm1 = vcmask 261120   ;;  %vm250_vm2 = vcmask 1041409   ;;  %vm253_vm3 = vcmask 1042434  }
  0x40   :  { %858 = vmatpush3.bf16.msra.mxu1 %v961_v40  ;;  %v965_v44 = vld [vmem:[#allocation4 + $0x10] sm:$0xff]   ;;  %v967_v46 = vld [vmem:[#allocation4 + $0x18] sm:$0xff]   ;;  %v968_v47 = vld [vmem:[#allocation4 + $0x60] sm:$0xff]   ;;  %vm256_vm4 = vcmask 1043459   ;;  %vm259_vm5 = vcmask 1044484   ;;  %vm262_vm6 = vcmask 1045509  }
  0x41   :  { %396 = vmatpush1.bf16.msra.mxu0 %v944_v26  ;;  %859 = vmatprep.subr.bf16.mxu1 %v962_v41  ;;  %v969_v48 = vld [vmem:[#allocation4 + $0x20] sm:$0xff]   ;;  %v970_v49 = vld [vmem:[#allocation4 + $0x68] sm:$0xff]   ;;  %v74_v54 = vld [vmem:[%s1275_s0 + $0x10] sm:$0xff]  ;;  %vm265_vm7 = vcmask 1046534   ;;  %vm268_vm8 = vcmask 1047559   ;;  %vm280_vm9 = vcmask 523264  }
  0x42   :  { %86 = vbcast.lane.b32.xlu1 %v84_v7, 256  ;;  %397 = vmatprep.subr.bf16.mxu0 %v945_v28  ;;  %v971_v50 = vld [vmem:[#allocation4 + $0x28] sm:$0xff]   ;;  %v72_v57 = vld [vmem:[%s1275_s0] sm:$0xff]  ;;  %v75_v58 = vld [vmem:[%s1275_s0 + $0x18] sm:$0xff]  ;;  %vm1084_vm10 = vmmov 0  }
  0x43   :  { %v76_v59 = vld [vmem:[%s1275_s0 + $0x20] sm:$0xff]  ;;  %v77_v62 = vld [vmem:[%s1275_s0 + $0x28] sm:$0xff]  ;;  %v78_v4 = vld [vmem:[%s1275_s0 + $0x30] sm:$0xff] }
  0x44   :  { %860 = vmatpush3.bf16.msra.mxu1 %v963_v42  ;;  %v79_v12 = vld [vmem:[%s1275_s0 + $0x38] sm:$0xff] }
  0x45   :  { %398 = vmatpush1.bf16.msra.mxu0 %v947_v29  ;;  %861 = vmatprep.subr.bf16.mxu1 %v964_v43  ;;  %v983_v1 = vld [vmem:[%s1281_s6 + $0x38] sm:$0xff]  }
  0x46   :  { %107 = vbcast.lane.b32.xlu1 %v105_v9, 256  ;;  %399 = vmatprep.subr.bf16.mxu0 %v948_v30 }
  0x48   :  { %862 = vmatpush3.bf16.msra.mxu1 %v965_v44 }
  0x49   :  { %400 = vmatpush1.bf16.msra.mxu0 %v950_v31  ;;  %863 = vmatprep.subr.bf16.mxu1 %v966_v45 }
  0x4a   :  { %114 = vbcast.lane.b32.xlu1 %v112_v11, 256  ;;  %401 = vmatprep.subr.bf16.mxu0 %v951_v32  ;;  %v73_v32 = vld [vmem:[%s1275_s0 + $0x8] sm:$0xff] }
  0x4c   :  { %864 = vmatpush3.bf16.msra.mxu1 %v967_v46 }
  0x4d   :  { %402 = vmatpush1.bf16.msra.mxu0 %v953_v33  ;;  %865 = vmatprep.subr.bf16.mxu1 %v968_v47 }
  0x4e   :  { %121 = vbcast.lane.b32.xlu1 %v119_v13, 256  ;;  %93 = vbcast.lane.b32.xlu0 %v91_v20, 256 }
  0x4f   :  { %403 = vmatprep.subr.bf16.mxu0 %v954_v34 }
  0x50   :  { %866 = vmatpush3.bf16.msra.mxu1 %v969_v48 }
  0x51   :  { %404 = vmatpush1.bf16.msra.mxu0 %v956_v35  ;;  %867 = vmatprep.subr.bf16.mxu1 %v970_v49 }
  0x52   :  { %128 = vbcast.lane.b32.xlu1 %v126_v18, 256  ;;  %272 = vrot.lane.b32.xlu0 %v239_v24, %s1081_s11 }
  0x53   :  { %405 = vmatprep.subr.bf16.mxu0 %v957_v36 }
  0x54   :  { %868 = vmatpush3.bf16.msra.mxu1 %v971_v50 }
  0x55   :  { %406 = vmatpush1.bf16.msra.mxu0 %v959_v37 }
  0x56   :  { %135 = vbcast.lane.b32.xlu1 %v133_v23, 256 }
  0x5a   :  { %276 = vrot.lane.b32.xlu1 %v240_v27, %s1075_s19 }
  0xb0   :  { %v101_v51 = vpop.permute.xlu1 %100 }
  0xb1   :  { %v139_v56 = vmul.f32 %v101_v51, %v74_v54 }
  0xb3   :  { %v160_v63 = vsel %vm145_vm1, %v139_v56, 0.0 }
  0xb4   :  { %v87_v52 = vpop.permute.xlu1 %86  ;;  %v161_v6 = vrot.slane %v160_v63, 4 }
  0xb5   :  { %v137_v60 = vmul.f32 %v87_v52, %v72_v57 }
  0xb6   :  { %v162_v17 = vadd.f32 %v161_v6, %v160_v63 }
  0xb7   :  { %v146_v7 = vsel %vm145_vm1, %v137_v60, 0.0 }
  0xb8   :  { %v108_v53 = vpop.permute.xlu1 %107  ;;  %v147_v13 = vrot.slane %v146_v7, 4  ;;  %v163_v28 = vrot.slane %v162_v17, 2 }
  0xb9   :  { %v140_v0 = vmul.f32 %v108_v53, %v75_v58 }
  0xba   :  { %v148_v25 = vadd.f32 %v147_v13, %v146_v7  ;;  %v164_v53 = vadd.f32 %v163_v28, %v162_v17 }
  0xbb   :  { %v167_v9 = vsel %vm145_vm1, %v140_v0, 0.0 }
  0xbc   :  { %v115_v55 = vpop.permute.xlu1 %114  ;;  %v168_v18 = vrot.slane %v167_v9, 4  ;;  %v149_v41 = vrot.slane %v148_v25, 2 }
  0xbd   :  { %v141_v2 = vmul.f32 %v115_v55, %v76_v59 }
  0xbe   :  { %v169_v29 = vadd.f32 %v168_v18, %v167_v9  ;;  %v150_v56 = vadd.f32 %v149_v41, %v148_v25 }
  0xbf   :  { %v174_v10 = vsel %vm145_vm1, %v141_v2, 0.0 }
  0xc0   :  { %v122_v61 = vpop.permute.xlu1 %121  ;;  %v175_v19 = vrot.slane %v174_v10, 4  ;;  %v170_v44 = vrot.slane %v169_v29, 2 }
  0xc1   :  { %v142_v5 = vmul.f32 %v122_v61, %v77_v62  ;;  %v165_v62 = vrot.slane %v164_v53, 1 }
  0xc2   :  { %v176_v30 = vadd.f32 %v175_v19, %v174_v10  ;;  %v171_v54 = vadd.f32 %v170_v44, %v169_v29 }
  0xc3   :  { %v181_v14 = vsel %vm145_vm1, %v142_v5, 0.0  ;;  %v151_v5 = vrot.slane %v150_v56, 1  ;;  %v166_v13 = vadd.f32 %v165_v62, %v164_v53  ;;  %v972_v53 = vld [vmem:[#allocation4 + $0x70] sm:$0xff]   ;;  %v980_v62 = vld [vmem:[%s1281_s6 + $0x20] sm:$0xff]  }
  0xc4   :  { %v129_v8 = vpop.permute.xlu1 %128  ;;  %v182_v23 = vrot.slane %v181_v14, 4  ;;  %v177_v45 = vrot.slane %v176_v30, 2  ;;  %v172_v0 = vrot.slane %v171_v54, 1  ;;  %869 = vmatprep.subr.bf16.mxu1 %v972_v53 }
  0xc5   :  { %v143_v11 = vmul.f32 %v129_v8, %v78_v4  ;;  %v205_v24 = vpop.xlane.xlu0 %204  ;;  %v152_v19 = vadd.f32 %v151_v5, %v150_v56  ;;  %v975_v56 = vld [vmem:[#allocation4 + $0x38] sm:$0xff]  }
  0xc6   :  { %v206_v26 = vmax.f32 %v205_v24, 1e-09  ;;  %v183_v37 = vadd.f32 %v182_v23, %v181_v14  ;;  %v178_v57 = vadd.f32 %v177_v45, %v176_v30 }
  0xc7   :  { %v188_v16 = vsel %vm145_vm1, %v143_v11, 0.0 }
  0xc8   :  { %v136_v20 = vpop.permute.xlu1 %135  ;;  %v189_v21 = vrot.slane %v188_v16, 4  ;;  %v208_v34 = vrot.slane %v206_v26, 1  ;;  %v209_v35 = vrot.slane %v206_v26, 2  ;;  %v210_v36 = vrot.slane %v206_v26, 3 }
  0xc9   :  { %v144_v22 = vmul.f32 %v136_v20, %v79_v12  ;;  %988 = vrcp.f32 %v206_v26  ;;  %v94_v39 = vpop.permute.xlu0 %93  ;;  %v211_v40 = vrot.slane %v206_v26, 4  ;;  %v212_v43 = vrot.slane %v206_v26, 5 }
  0xca   :  { %v190_v33 = vadd.f32 %v189_v21, %v188_v16  ;;  %990 = vrcp.f32 %v208_v34  ;;  %v138_v42 = vmul.f32 %v94_v39, %v73_v32  ;;  %v213_v46 = vrot.slane %v206_v26, 6 }
  0xcb   :  { %v195_v27 = vsel %vm145_vm1, %v144_v22, 0.0  ;;  %992 = vrcp.f32 %v209_v35  ;;  %v214_v49 = vrot.slane %v206_v26, 7  ;;  %v184_v50 = vrot.slane %v183_v37, 2 }
  0xcc   :  { %v196_v31 = vrot.slane %v195_v27, 4  ;;  %v191_v47 = vrot.slane %v190_v33, 2  ;;  %v153_v48 = vsel %vm145_vm1, %v138_v42, 0.0  ;;  %994 = vrcp.f32 %v210_v36 }
  0xcd   :  { %v154_v52 = vrot.slane %v153_v48, 4  ;;  %996 = vrcp.f32 %v211_v40  ;;  %v185_v59 = vadd.f32 %v184_v50, %v183_v37  ;;  %v179_v6 = vrot.slane %v178_v57, 1  ;;  %v273_v44 = vpop.permute.xlu0 %272 }
  0xce   :  { %v197_v38 = vadd.f32 %v196_v31, %v195_v27  ;;  %998 = vrcp.f32 %v212_v43  ;;  %v192_v58 = vadd.f32 %v191_v47, %v190_v33  ;;  %v173_v16 = vadd.f32 %v172_v0, %v171_v54  ;;  %v973_v54 = vld [vmem:[#allocation4 + $0x30] sm:$0xff]   ;;  %v299_v0 = vld [vmem:[#allocation6] ss:$4 sm:$0x3] }
  0xcf   :  { %v155_v55 = vadd.f32 %v154_v52, %v153_v48  ;;  %1000 = vrcp.f32 %v213_v46  ;;  %v186_v9 = vrot.slane %v185_v59, 1  ;;  %v180_v20 = vadd.f32 %v179_v6, %v178_v57  ;;  %v277_v48 = vpop.permute.xlu1 %276  ;;  %870 = vmatpush3.bf16.msra.mxu1 %v973_v54  ;;  %v976_v57 = vld [vmem:[%s1281_s6] sm:$0xff]  }
  0xd0   :  { %v198_v51 = vrot.slane %v197_v38, 2  ;;  %1002 = vrcp.f32 %v214_v49  ;;  %v193_v7 = vrot.slane %v192_v58, 1 }
  0xd1   :  { %v156_v61 = vrot.slane %v155_v55, 2  ;;  %v187_v24 = vadd.f32 %v186_v9, %v185_v59  ;;  %v977_v59 = vld [vmem:[%s1281_s6 + $0x8] sm:$0xff]  }
  0xd2   :  { %v199_v60 = vadd.f32 %v198_v51, %v197_v38  ;;  %v194_v21 = vadd.f32 %v193_v7, %v192_v58  ;;  %v1083_v58 = vmov 0.0  }
  0xd3   :  { %v989_v63 = vpop.eup %988  ;;  %v157_v2 = vadd.f32 %v156_v61, %v155_v55  ;;  %v974_v55 = vld [vmem:[#allocation4 + $0x78] sm:$0xff]   ;;  %893 = vmatprep.subr.bf16.mxu0 %v1083_v58 }
  0xd4   :  { %v991_v4 = vpop.eup %990  ;;  %v200_v10 = vrot.slane %v199_v60, 1  ;;  %v224_v30 = vmul.f32 %v989_v63, %v152_v19  ;;  %871 = vmatprep.subr.bf16.mxu1 %v974_v55  ;;  %v979_v61 = vld [vmem:[%s1281_s6 + $0x18] sm:$0xff]   ;;  %v981_v63 = vld [vmem:[%s1281_s6 + $0x28] sm:$0xff]  }
  0xd5   :  { %v993_v8 = vpop.eup %992  ;;  %v158_v11 = vrot.slane %v157_v2, 1  ;;  %872 = vmatpush3.bf16.msra.mxu1 %v975_v56 }
  0xd6   :  { %v995_v12 = vpop.eup %994  ;;  %v228_v22 = vmul.f32 %v993_v8, %v166_v13  ;;  %v201_v25 = vadd.f32 %v200_v10, %v199_v60  ;;  %913 = vmatprep.subr.bf16.mxu1 %v1083_v58  ;;  %v978_v60 = vld [vmem:[%s1281_s6 + $0x10] sm:$0xff]  }
  0xd7   :  { %v997_v14 = vpop.eup %996  ;;  %v159_v17 = vadd.f32 %v158_v11, %v157_v2  ;;  %v230_v27 = vmul.f32 %v995_v12, %v173_v16  ;;  %v304_v2 = vrot.slane %v299_v0, %v83_v3  ;;  %v982_v16 = vld [vmem:[%s1281_s6 + $0x30] sm:$0xff]   ;;  %v984_v3 = vld [vmem:[%s1282_s7] sm:$0xff]  }
  0xd8   :  { %v999_v18 = vpop.eup %998  ;;  %v232_v29 = vmul.f32 %v997_v14, %v180_v20  ;;  %v252_v34 = vrot.slane %v228_v22, 6 }
  0xd9   :  { %v1001_v23 = vpop.eup %1000  ;;  %v226_v26 = vmul.f32 %v991_v4, %v159_v17  ;;  %v234_v32 = vmul.f32 %v999_v18, %v187_v24  ;;  %v255_v37 = vrot.slane %v230_v27, 5  ;;  %v308_v4 = vrot.slane %v299_v0, %v90_v15  ;;  %v985_v15 = vld [vmem:[%s1282_s7 + $0x8] sm:$0xff]   ;;  %v825_v18 = vld [vmem:[#allocation6 + $0x1] ss:$0 sm:$0xff]  ;;  %v987_v27 = vld [vmem:[%s1282_s7 + $0x18] sm:$0xff]  }
  0xda   :  { %v1003_v28 = vpop.eup %1002  ;;  %v236_v33 = vmul.f32 %v1001_v23, %v194_v21  ;;  %v258_v39 = vrot.slane %v232_v29, 4 }
  0xdb   :  { %v249_v31 = vrot.slane %v226_v26, 7  ;;  %v238_v36 = vmul.f32 %v1003_v28, %v201_v25  ;;  %v261_v41 = vrot.slane %v234_v32, 3  ;;  %v986_v26 = vld [vmem:[%s1282_s7 + $0x10] sm:$0xff]   ;;  %v842_v28 = vld [vmem:[#allocation6 + $0x2] ss:$0 sm:$0xff] }
  0xdc   :  { %v264_v43 = vrot.slane %v236_v33, 2 }
  0xdd   :  { %v251_v35 = vsel %vm250_vm2, %v249_v31, %v224_v30  ;;  %v267_v46 = vrot.slane %v238_v36, 1  ;;  %v851_v36 = vld [vmem:[#allocation6 + $0x3] ss:$0 sm:$0xff] }
  0xde   :  { %v254_v38 = vsel %vm253_vm3, %v252_v34, %v251_v35 }
  0xdf   :  { %v257_v40 = vsel %vm256_vm4, %v255_v37, %v254_v38 }
  0xe0   :  { %v260_v42 = vsel %vm259_vm5, %v258_v39, %v257_v40 }
  0xe1   :  { %v263_v45 = vsel %vm262_vm6, %v261_v41, %v260_v42 }
  0xe2   :  { %v266_v47 = vsel %vm265_vm7, %v264_v43, %v263_v45 }
  0xe3   :  { %v269_v49 = vsel %vm268_vm8, %v267_v46, %v266_v47 }
  0xe4   :  { %v279_v50 = vsel %vm145_vm1, %v269_v49, %v273_v44 }
  0xe5   :  { %v281_v51 = vsel %vm280_vm9, %v279_v50, %v277_v48 }
  0xe6   :  { %v282_v52 = vpack.c.bf16 %v281_v51, %v281_v51 }
  0xe8   :  { %424 = vmatmul.mubr.bf16.vlgmr.msra.gmra.mrb[0].mxu0 %v282_v52 }
  0xe9   :  { %894 = vmatpush3.bf16.msra.mxu0 %v976_v57  ;;  %909 = vmatprep.mubr.msk.bf16.mxu0 %vm1084_vm10, %v1083_v58 }
  0xea   :  { %895 = vmatprep.subr.bf16.mxu0 %v1083_v58 }
  0xed   :  { %896 = vmatpush3.bf16.msra.mxu0 %v977_v59 }
  0xee   :  { %897 = vmatprep.subr.bf16.mxu0 %v1083_v58 }
  0xf1   :  { %898 = vmatpush3.bf16.msra.mxu0 %v978_v60 }
  0xf2   :  { %899 = vmatprep.subr.bf16.mxu0 %v1083_v58 }
  0xf5   :  { %900 = vmatpush3.bf16.msra.mxu0 %v979_v61 }
  0xf6   :  { %901 = vmatprep.subr.bf16.mxu0 %v1083_v58 }
  0xf9   :  { %902 = vmatpush3.bf16.msra.mxu0 %v980_v62 }
  0xfa   :  { %903 = vmatprep.subr.bf16.mxu0 %v1083_v58 }
  0xfd   :  { %904 = vmatpush3.bf16.msra.mxu0 %v981_v63 }
  0xfe   :  { %905 = vmatprep.subr.bf16.mxu0 %v1083_v58 }
 0x101   :  { %906 = vmatpush3.bf16.msra.mxu0 %v982_v16 }
 0x102   :  { %907 = vmatprep.subr.bf16.mxu0 %v1083_v58 }
 0x105   :  { %908 = vmatpush3.bf16.msra.mxu0 %v983_v1 }
 0x1bb   :  { %v425_v5 = vpop.f32.mrb[0].mxu0 }
 0x1bc   :  { %v426_v6 = vadd.f32 %v425_v5, %v304_v2  ;;  %v427_v7 = vpop.f32.mrb[1].mxu0 }
 0x1bd   :  { %v428_v8 = vadd.f32 %v427_v7, %v308_v4  ;;  %v429_v9 = vpop.f32.mrb[2].mxu0 }
 0x1be   :  { %v432_v10 = vmax.f32 %v426_v6, 0.0  ;;  %v430_v11 = vpop.f32.mrb[3].mxu0 }
 0x1bf   :  { %v433_v12 = vmax.f32 %v428_v8, 0.0 }
 0x1c0   :  { %v434_v14 = vpack.c.bf16 %v432_v10, %v432_v10 }
 0x1c1   :  { %v435_v13 = vpack.c.bf16 %v433_v12, %v433_v12 }
 0x1c3   :  { %601 = vmatprep.mubr.bf16.mxu1 %v435_v13 }
 0x1c4   :  { %602 = vmatmul.mubr.bf16.vlgmr.msra.gmra.mrb[0].mxu1 %v434_v14 }
 0x1c5   :  { %921 = vmatprep.mubr.msk.bf16.mxu1 %vm1084_vm10, %v1083_v58  ;;  %914 = vmatpush3.bf16.msra.mxu1 %v984_v3 }
 0x1c6   :  { %915 = vmatprep.subr.bf16.mxu1 %v1083_v58 }
 0x1c9   :  { %916 = vmatpush3.bf16.msra.mxu1 %v985_v15 }
 0x1ca   :  { %917 = vmatprep.subr.bf16.mxu1 %v1083_v58 }
 0x1cd   :  { %918 = vmatpush3.bf16.msra.mxu1 %v986_v26 }
 0x1ce   :  { %919 = vmatprep.subr.bf16.mxu1 %v1083_v58 }
 0x1d1   :  { %920 = vmatpush3.bf16.msra.mxu1 %v987_v27 }
 0x297   :  { %v873_v17 = vpop.f32.mrb[0].mxu1 }
 0x298   :  { %v874_v19 = vpop.f32.mrb[1].mxu1 }
 0x299   :  { %v875_v20 = vadd.f32 %v874_v19, %v873_v17  ;;  %v876_v21 = vpop.f32.mrb[2].mxu1 }
 0x29a   :  { %v877_v22 = vpop.f32.mrb[3].mxu1 }
 0x29b   :  { %v604_v23 = vadd.f32 %v875_v20, %v825_v18 }
 0x29d   :  { %v609_v24 = vmax.f32 %v604_v23, 0.0 }
 0x29f   :  { %v610_v25 = vpack.c.bf16 %v609_v24, %v609_v24 }
 0x2a1   :  { %910 = vmatmul.mubr.bf16.vlgmr.msra.gmra.mrb[4].mxu0 %v610_v25 }
 0x374   :  { %v714_v29 = vpop.f32.mrb[4].mxu0 }
 0x375   :  { %v715_v30 = vadd.f32 %v842_v28, %v714_v29  ;;  %v911_v31 = vpop.f32.mrb[5].mxu0 }
 0x376   :  { %v717_v32 = vpop.f32.mrb[6].mxu0 }
 0x377   :  { %v720_v33 = vmax.f32 %v715_v30, 0.0  ;;  %v912_v34 = vpop.f32.mrb[7].mxu0 }
 0x379   :  { %v721_v35 = vpack.c.bf16 %v720_v33, %v720_v33 }
 0x37b   :  { %922 = vmatmul.mubr.msk.bf16.vlgmr.msra.gmra.mrb[4].mxu1 %vm280_vm9, %v721_v35 }
 0x44e   :  { %v796_v37 = vpop.f32.mrb[4].mxu1 }
 0x44f   :  { %v797_v38 = vadd.f32 %v851_v36, %v796_v37  ;;  %v923_v39 = vpop.f32.mrb[5].mxu1 }
 0x450   :  { %v799_v40 = vpop.f32.mrb[6].mxu1 }
 0x451   :  { %802 = vst [vmem:[%s1284_s9] sm:$0xff] %v797_v38  ;;  %v924_v41 = vpop.f32.mrb[7].mxu1 }
 0x452   :  { %807 = vsyncpa [#allocation3], 1 }
 0x453   :  { %808 = vsyncpa [#allocation5], 1 }

</bundles_post_ra>
